<compile_context>
chip_gen: v5e
topology: v5e:2x2
jax: 0.10.0
libtpu: 0.0.40
codegen_flags: <defaults>
</compile_context>

<pallas_src>
import math
import numpy as np
import jax
import jax.numpy as jnp
from jax.experimental import pallas as pl
from jax.experimental.pallas import tpu as pltpu

STRIDE = 2
PADDING = 2
KH = KW = 4
OUT_HW = 7
NEG_SLOPE = -0.1795
OUT_PAD = 56  # 49 output pixels padded up to a sublane multiple of 8


def _round_up(x, m):
    return (x + m - 1) // m * m


def interp_matrix(out_size, in_size):
    """Dense bilinear (align_corners=True) 1-D interpolation matrix (out, in)."""
    assert out_size >= 2 and in_size >= 2
    A = np.zeros((out_size, in_size), np.float32)
    for j in range(out_size):
        pos = j * (in_size - 1) / (out_size - 1)
        p0 = int(math.floor(pos))
        p1 = min(p0 + 1, in_size - 1)
        f = pos - p0
        A[j, p0] += 1.0 - f
        A[j, p1] += f
    return A


def restricted_interp(out_size, in_size):
    """Source indices actually read by align_corners=True bilinear resize and
    the (out_size, n_idx) weight matrix restricted to those indices."""
    assert out_size >= 2 and in_size >= 2
    samples = []
    for j in range(out_size):
        pos = j * (in_size - 1) / (out_size - 1)
        p0 = int(math.floor(pos))
        p1 = min(p0 + 1, in_size - 1)
        samples.append((p0, p1, pos - p0))
    idx = sorted({p for p0, p1, _ in samples for p in (p0, p1)})
    pos_of = {p: i for i, p in enumerate(idx)}
    A = np.zeros((out_size, len(idx)), np.float32)
    for j, (p0, p1, f) in enumerate(samples):
        A[j, pos_of[p0]] += 1.0 - f
        A[j, pos_of[p1]] += f
    return np.asarray(idx, np.int32), A


def _stuffed_input(x_nchw):
    """Zero-stuffed (stride-2 dilated) + padded NHWC input so the
    conv-transpose becomes a plain convolution with a flipped kernel."""
    N, C_in, H, W = x_nchw.shape
    H_out = (H - 1) * STRIDE - 2 * PADDING + KH
    W_out = (W - 1) * STRIDE - 2 * PADDING + KW
    x_nhwc = jnp.transpose(x_nchw, (0, 2, 3, 1))
    H_up = (H - 1) * STRIDE + 1
    W_up = (W - 1) * STRIDE + 1
    pad = KH - 1 - PADDING  # = 1
    up = jnp.zeros((N, H_up, W_up, C_in), x_nchw.dtype)
    up = up.at[:, ::STRIDE, ::STRIDE, :].set(x_nhwc)
    x_pad = jnp.pad(up, ((0, 0), (pad, pad), (pad, pad), (0, 0)))
    return x_pad, H_out, W_out


def _conv_weight(w_t):
    # PyTorch ConvTranspose2d weight: (C_in, C_out, KH, KW).
    # Equivalent regular-conv weight: flip spatial dims -> (KH, KW, C_in, C_out).
    return jnp.transpose(w_t[:, :, ::-1, ::-1], (2, 3, 0, 1))


def _kernel(lhs_ref, w_ref, wi_ref, o_ref):
    # lhs_ref: (P_pad, K)       im2col patches of the needed conv positions
    # w_ref:   (K, tc)          conv-transpose weight tile, taps folded into K
    # wi_ref:  (OUT_PAD, P_pad) fused 2-D bilinear interpolation weights
    # o_ref:   (OUT_PAD, tc)
    z1 = jnp.dot(lhs_ref[...], w_ref[...], preferred_element_type=jnp.float32)
    # z4 = where(z1 > 1, z1, z1 * -0.1795)
    z4 = jnp.where(z1 > 1.0, z1, z1 * NEG_SLOPE)
    o_ref[...] = jnp.dot(wi_ref[...], z4,
                         preferred_element_type=jnp.float32).astype(o_ref.dtype)


def conv_t_where_interp(x_nchw, w_t, *, tc=256):
    N, C_in, H, W = x_nchw.shape
    C_in_w, C_out, _, _ = w_t.shape
    assert C_in == C_in_w

    x_pad, H_out, W_out = _stuffed_input(x_nchw)

    # Only the conv-output rows / cols the 7x7 resize actually reads.
    rows_idx, Ah_r = restricted_interp(OUT_HW, H_out)   # (NR,), (7, NR)
    cols_idx, Aw_r = restricted_interp(OUT_HW, W_out)   # (NC,), (7, NC)
    NR, NC = len(rows_idx), len(cols_idx)
    P = NR * NC
    P_pad = _round_up(P, 8)
    K = KH * KW * C_in                                  # = 160

    # im2col gather of the needed 4x4 patches: (N, P, K).
    rr = rows_idx[:, None, None, None] + np.arange(KH)[None, None, :, None]
    cc = cols_idx[None, :, None, None] + np.arange(KW)[None, None, None, :]
    patches = x_pad[:, rr, cc, :]                       # (N, NR, NC, KH, KW, C_in)
    lhs = patches.reshape(N, P, K)
    lhs = jnp.pad(lhs, ((0, 0), (0, P_pad - P), (0, 0)))

    # Weight with all taps folded into the contraction dim, channels padded
    # to a multiple of the channel tile (handles C_out = 3155).
    w2d = _conv_weight(w_t).reshape(K, C_out)
    C_pad = _round_up(C_out, tc)
    w2d = jnp.pad(w2d, ((0, 0), (0, C_pad - C_out)))

    # Fused (7x7 <- NRxNC) bilinear interpolation matrix, padded to (56, P_pad).
    wi = np.einsum('ia,jb->ijab', Ah_r, Aw_r).reshape(OUT_HW * OUT_HW, P)
    wi_pad = np.zeros((OUT_PAD, P_pad), np.float32)
    wi_pad[:OUT_HW * OUT_HW, :P] = wi
    wi_pad = jnp.asarray(wi_pad)

    num_c = C_pad // tc
    out = pl.pallas_call(
        _kernel,
        out_shape=jax.ShapeDtypeStruct((N, OUT_PAD, C_pad), jnp.float32),
        grid_spec=pltpu.PrefetchScalarGridSpec(
            num_scalar_prefetch=0,
            # Batch innermost: the weight tile's block index is constant across
            # it, so each (K, tc) weight slab is DMA'd from HBM only once.
            grid=(num_c, N),
            in_specs=[
                pl.BlockSpec((None, P_pad, K), lambda c, n: (n, 0, 0)),
                pl.BlockSpec((K, tc), lambda c, n: (0, c)),
                pl.BlockSpec((OUT_PAD, P_pad), lambda c, n: (0, 0)),
            ],
            out_specs=pl.BlockSpec((None, OUT_PAD, tc), lambda c, n: (n, 0, c)),
        ),
        compiler_params=pltpu.CompilerParams(
            dimension_semantics=("parallel", "parallel")),
    )(lhs, w2d, wi_pad)

    out = out[:, :OUT_HW * OUT_HW, :C_out].reshape(N, OUT_HW, OUT_HW, C_out)
    return jnp.transpose(out, (0, 3, 1, 2))             # back to NCHW


def reference_forward(x_nchw, w_t):
    """Plain-JAX reference of the PyTorch module's forward (dense path)."""
    N, C_in, H, W = x_nchw.shape
    _, C_out, _, _ = w_t.shape
    x_pad, H_out, W_out = _stuffed_input(x_nchw)
    w_conv = _conv_weight(w_t)
    z1 = jnp.zeros((N, H_out, W_out, C_out), jnp.float32)
    for kh in range(KH):
        for kw in range(KW):
            z1 = z1 + jnp.einsum('nhwi,io->nhwo',
                                 x_pad[:, kh:kh + H_out, kw:kw + W_out, :],
                                 w_conv[kh, kw])
    z4 = jnp.where(z1 > 1.0, z1, z1 * NEG_SLOPE)
    Ah = jnp.asarray(interp_matrix(OUT_HW, H_out))
    Aw = jnp.asarray(interp_matrix(OUT_HW, W_out))
    out = jnp.einsum('ih,jw,nhwc->nijc', Ah, Aw, z4)
    return jnp.transpose(out, (0, 3, 1, 2))


if __name__ == "__main__":
    key = jax.random.PRNGKey(0)
    k_x, k_w = jax.random.split(key)

    # Small shapes consistent with the module: original x6 is (2, 10, 109, 96)
    # with 3155 output channels; keep C_in=10 / k=4 / stride=2 / padding=2 and
    # shrink spatial & C_out. C_out=300 (not a multiple of 128/256) exercises
    # the same channel-padding path the real 3155 needs.
    N, C_in, H, W = 2, 10, 17, 17
    C_out = 300

    x = jax.random.normal(k_x, (N, C_in, H, W), dtype=jnp.float32)
    w_t = jax.random.normal(k_w, (C_in, C_out, KH, KW), dtype=jnp.float32) * 0.05

    out = conv_t_where_interp(x, w_t)
    out = jax.block_until_ready(out)
    assert out.shape == (N, C_out, OUT_HW, OUT_HW), out.shape

    ref = jax.block_until_ready(reference_forward(x, w_t))
    err = float(jnp.max(jnp.abs(out - ref)))
    assert jnp.allclose(out, ref, rtol=1e-3, atol=1e-3), err

    print("KERNEL_OK")
</pallas_src>

<mosaic_0001>
module attributes {stable_mosaic.version = 11 : i64} {
  func.func @_kernel(%arg0: i32, %arg1: i32, %arg2: memref<1x176x160xf32, #tpu.memory_space<vmem>>, %arg3: memref<160x256xf32, #tpu.memory_space<vmem>>, %arg4: memref<56x176xf32, #tpu.memory_space<vmem>>, %arg5: memref<1x56x256xf32, #tpu.memory_space<vmem>>) attributes {dimension_semantics = [#tpu.dimension_semantics<parallel>, #tpu.dimension_semantics<parallel>], iteration_bounds = array<i64: 2, 2>, scalar_prefetch = 0 : i64, scratch_operands = 0 : i64, tpu.core_type = #tpu.core_type<tc>, window_params = [{transform_indices = @transform_0, window_bounds = array<i64: 1, 176, 160>}, {transform_indices = @transform_1, window_bounds = array<i64: 160, 256>}, {pipeline_mode = #tpu.pipeline_mode<synchronous>, transform_indices = @transform_2, window_bounds = array<i64: 56, 176>}, {transform_indices = @transform_3, window_bounds = array<i64: 1, 56, 256>}]} {
    %c0 = arith.constant 0 : index
    %c0_0 = arith.constant 0 : index
    %c0_1 = arith.constant 0 : index
    %0 = vector.load %arg2[%c0, %c0_0, %c0_1] : memref<1x176x160xf32, #tpu.memory_space<vmem>>, vector<1x176x160xf32>
    %1 = vector.shape_cast %0 : vector<1x176x160xf32> to vector<176x160xf32>
    %c0_2 = arith.constant 0 : index
    %c0_3 = arith.constant 0 : index
    %2 = vector.load %arg3[%c0_2, %c0_3] : memref<160x256xf32, #tpu.memory_space<vmem>>, vector<160x256xf32>
    %cst = arith.constant dense<0.000000e+00> : vector<176x256xf32>
    %3 = tpu.matmul %1, %2, %cst {dimension_numbers = #tpu.dot_dimension_numbers<[1], [0], [0], [1], [0, 0, 1, 1], [], []>} : vector<176x160xf32>, vector<160x256xf32>, vector<176x256xf32> -> vector<176x256xf32>
    %cst_4 = arith.constant 1.000000e+00 : f32
    %4 = vector.broadcast %cst_4 : f32 to vector<176x256xf32>
    %5 = arith.cmpf ogt, %3, %4 : vector<176x256xf32>
    %cst_5 = arith.constant -1.795000e-01 : f32
    %6 = vector.broadcast %cst_5 : f32 to vector<176x256xf32>
    %7 = arith.mulf %3, %6 : vector<176x256xf32>
    %8 = arith.select %5, %3, %7 : vector<176x256xi1>, vector<176x256xf32>
    %c0_6 = arith.constant 0 : index
    %c0_7 = arith.constant 0 : index
    %9 = vector.load %arg4[%c0_6, %c0_7] : memref<56x176xf32, #tpu.memory_space<vmem>>, vector<56x176xf32>
    %cst_8 = arith.constant dense<0.000000e+00> : vector<56x256xf32>
    %10 = tpu.matmul %9, %8, %cst_8 {dimension_numbers = #tpu.dot_dimension_numbers<[1], [0], [0], [1], [0, 0, 1, 1], [], []>} : vector<56x176xf32>, vector<176x256xf32>, vector<56x256xf32> -> vector<56x256xf32>
    %c0_9 = arith.constant 0 : index
    %c0_10 = arith.constant 0 : index
    %c0_11 = arith.constant 0 : index
    %11 = vector.load %arg5[%c0_9, %c0_10, %c0_11] : memref<1x56x256xf32, #tpu.memory_space<vmem>>, vector<1x56x256xf32>
    %12 = vector.shape_cast %11 : vector<1x56x256xf32> to vector<56x256xf32>
    %13 = vector.shape_cast %10 : vector<56x256xf32> to vector<1x56x256xf32>
    tpu.vector_store %arg5[%c0_9, %c0_10, %c0_11], %13 {strides = array<i32>} : memref<1x56x256xf32, #tpu.memory_space<vmem>>, vector<1x56x256xf32>,
    return
  }
  func.func @transform_0(%arg0: i32, %arg1: i32) -> (i32, i32, i32) {
    %c0_i32 = arith.constant 0 : i32
    %c0_i32_0 = arith.constant 0 : i32
    %c0_i32_1 = arith.constant 0 : i32
    return %arg1, %c0_i32, %c0_i32_0 : i32, i32, i32
  }
  func.func @transform_1(%arg0: i32, %arg1: i32) -> (i32, i32) {
    %c0_i32 = arith.constant 0 : i32
    %c0_i32_0 = arith.constant 0 : i32
    return %c0_i32, %arg0 : i32, i32
  }
  func.func @transform_2(%arg0: i32, %arg1: i32) -> (i32, i32) {
    %c0_i32 = arith.constant 0 : i32
    %c0_i32_0 = arith.constant 0 : i32
    %c0_i32_1 = arith.constant 0 : i32
    return %c0_i32, %c0_i32_0 : i32, i32
  }
  func.func @transform_3(%arg0: i32, %arg1: i32) -> (i32, i32, i32) {
    %c0_i32 = arith.constant 0 : i32
    %c0_i32_0 = arith.constant 0 : i32
    return %arg1, %c0_i32, %arg0 : i32, i32, i32
  }
}

</mosaic_0001>

<bundles_post_ra>
// kernel: tpu_custom_call.1
= control target key start
LH: loop header
LB: loop body
LE: loop exit
PB: predicated region body
PF: predicated region fallthrough
CT: control target
= control target key end

     0   :  { %8 = vsyncpa [#allocation4], 0  ;;  %s2227_s0 = inlined_call_operand.vmem [shape: f32[2,176,160], index: 0, kind: input, shape index: {}]   ;;  %s2228_s1 = inlined_call_operand.vmem [shape: f32[160,512], index: 1, kind: input, shape index: {}]   ;;  %s2229_s2 = inlined_call_operand.vmem [shape: f32[56,176], index: 2, kind: input, shape index: {}]   ;;  %s2230_s3 = inlined_call_operand.hbm [shape: f32[2,56,512], index: 3, kind: output, shape index: {}]  }
   0x1   :  { %10 = vsyncpa [#allocation4 + $0x1], 0  ;;  %s1555_s12 = smov 0   ;;  %s1557_s13 = smov 0  }
   0x2   :  { %s1559_s14 = smov 0   ;;  %s1561_s15 = smov 0  }
   0x3   :  { %s1563_s16 = smov 0   ;;  %s1565_s17 = smov 0  }
   0x4   :  { %s1567_s18 = smov 0   ;;  %s1569_s19 = smov 0  }
   0x5   :  { %s1571_s20 = smov 0   ;;  %s1573_s21 = smov 0  }
   0x6 LB: > { %s1232_s22 = sadd.s32 4294967295, %s1530_s21   ;;  %s1233_s23 = sadd.s32 4294967294, %s1530_s21   ;;  %s1530_s21 = sphi %s1573_s21, %s16_s21   ;;  %s1526_s20 = sphi %s1571_s20, %s2258_s20   ;;  %s1522_s19 = sphi %s1569_s19, %s2257_s19   ;;  %s1518_s18 = sphi %s1567_s18, %s2256_s18   ;;  %s1514_s17 = sphi %s1565_s17, %s2255_s17   ;;  %s1510_s16 = sphi %s1563_s16, %s2254_s16   ;;  %s1506_s15 = sphi %s1561_s15, %s2253_s15   ;;  %s1502_s14 = sphi %s1559_s14, %s2252_s14   ;;  %s1498_s13 = sphi %s1557_s13, %s2251_s13   ;;  %s1494_s12 = sphi %s1555_s12, %s2250_s12  }
   0x7   : > { %s25_s24 = sadd.s32 1, %s1522_s19  ;;  %s28_s25 = sadd.s32 1, %s1526_s20 }
   0x8   : > { %p26_p0 = scmp.ge.s32.totalorder %s25_s24, 2  ;;  %s61_s26 = sadd.s32 1, %s1510_s16 }
   0x9   : > { %p68_p1 = scmp.ne.s32.totalorder %s1510_s16, %s1506_s15  ;;  %p69_p2 = scmp.eq.s32.totalorder %s1530_s21, 0 }
   0xa   : > { %s2260_s24 = smov (%p26_p0, %s25_s24), 0  ;;  %s2262_s25 = smov (!%p26_p0, %s28_s25), %s1526_s20 }
   0xb   : > { %p1616_p3 = por %p69_p2, %p68_p1  ;;  %s105_s28 = ssub.s32 %s1522_s19, %s2260_s24 }
   0xc   : > { %p30_p4 = scmp.ge.s32.totalorder %s2262_s25, 2  ;;  %s110_s29 = sadd.s32 1, %s1502_s14 }
   0xd   : > { %p120_p5 = scmp.ne.s32.totalorder %s1502_s14, %s1498_s13  ;;  %p121_p6 = scmp.eq.s32.totalorder %s1232_s22, 3 }
   0xe   : > { %s2264_s25 = smov (%p30_p4, %s2262_s25), 0  ;;  %p126_p8 = scmp.ne.s32.totalorder %s1498_s13, %s1494_s12 }
   0xf   : > { %p1627_p7 = por %p121_p6, %p120_p5  ;;  %s58_s4 = ssub.s32 %s1526_s20, %s2264_s25 }
  0x10   : > { %p127_p9 = scmp.eq.s32.totalorder %s1233_s23, 3  ;;  %p59_p10 = scmp.eq.s32.totalorder %s58_s4, 0 }
  0x11   : > { %s107_s5 = sor.u32 %s105_s28, %s58_s4  ;;  %p1235_p13 = scmp.ge.s32.totalorder %s1530_s21, 4 }
  0x12   : > { %p108_p11 = scmp.eq.s32.totalorder %s107_s5, 0  ;;  %p1635_p12 = por %p127_p9, %p126_p8 }
  0x13   : > { %s1640_s7 = scalar_select %p59_p10, %s1510_s16, %s61_s26  }
  0x14   : > { %s1643_s8 = scalar_select %p108_p11, %s1502_s14, %s110_s29  }
  0x15   : > { %146 = sbr.rel (%p1235_p13) target bundleno = 70 (0x46), region = 20 }
  0x1a   : > { %157 = sbr.rel (!%p1616_p3) target bundleno = 70 (0x46), region = 28  ;;  %s159_s9 = sand.u32 (%p1616_p3), 1, %s1510_s16  }
  0x1b   : > { %s1302_s10 = sshll.u32 (%p1616_p3), %s1526_s20, 4  ;;  %s1325_s11 = smul.u32 (%p1616_p3), 320, %s159_s9 }
  0x1c   : > { %s1653_s28 = scalar_lea.vmem (%p1616_p3), %s2228_s1, %s1302_s10 }
  0x1d   : > { %v177_v0 = vld [vmem:[%s1653_s28] sm:$0xff] (%p1616_p3)  ;;  %v179_v1 = vld [vmem:[%s1653_s28 + $0x8] sm:$0xff] (%p1616_p3)  ;;  %s1658_s26 = scalar_lea.vmem (%p1616_p3), [#allocation2], %s1325_s11 }
  0x1e   : > { %v181_v2 = vld [vmem:[%s1653_s28 + $0x20] sm:$0xff] (%p1616_p3)  ;;  %178 = vst [vmem:[%s1658_s26] sm:$0xff] (%p1616_p3), %v177_v0  ;;  %v183_v3 = vld [vmem:[%s1653_s28 + $0x28] sm:$0xff] (%p1616_p3) }
  0x1f   : > { %180 = vst [vmem:[%s1658_s26 + $0x8] sm:$0xff] %v179_v1  ;;  %v185_v4 = vld [vmem:[%s1653_s28 + $0x40] sm:$0xff]  ;;  %v187_v5 = vld [vmem:[%s1653_s28 + $0x48] sm:$0xff] }
  0x20   : > { %182 = vst [vmem:[%s1658_s26 + $0x10] sm:$0xff] %v181_v2  ;;  %v189_v6 = vld [vmem:[%s1653_s28 + $0x60] sm:$0xff]  ;;  %v191_v7 = vld [vmem:[%s1653_s28 + $0x68] sm:$0xff] }
  0x21   : > { %184 = vst [vmem:[%s1658_s26 + $0x18] sm:$0xff] %v183_v3  ;;  %v193_v8 = vld [vmem:[%s1653_s28 + $0x80] sm:$0xff]  ;;  %v195_v9 = vld [vmem:[%s1653_s28 + $0x88] sm:$0xff] }
  0x22   : > { %186 = vst [vmem:[%s1658_s26 + $0x20] sm:$0xff] %v185_v4  ;;  %v197_v10 = vld [vmem:[%s1653_s28 + $0xa0] sm:$0xff]  ;;  %v199_v11 = vld [vmem:[%s1653_s28 + $0xa8] sm:$0xff] }
  0x23   : > { %188 = vst [vmem:[%s1658_s26 + $0x28] sm:$0xff] %v187_v5  ;;  %v201_v12 = vld [vmem:[%s1653_s28 + $0xc0] sm:$0xff]  ;;  %v203_v13 = vld [vmem:[%s1653_s28 + $0xc8] sm:$0xff] }
  0x24   : > { %190 = vst [vmem:[%s1658_s26 + $0x30] sm:$0xff] %v189_v6  ;;  %v205_v14 = vld [vmem:[%s1653_s28 + $0xe0] sm:$0xff]  ;;  %v207_v15 = vld [vmem:[%s1653_s28 + $0xe8] sm:$0xff] }
  0x25   : > { %192 = vst [vmem:[%s1658_s26 + $0x38] sm:$0xff] %v191_v7  ;;  %v209_v16 = vld [vmem:[%s1653_s28 + $0x100] sm:$0xff]  ;;  %v211_v17 = vld [vmem:[%s1653_s28 + $0x108] sm:$0xff] }
  0x26   : > { %194 = vst [vmem:[%s1658_s26 + $0x40] sm:$0xff] %v193_v8  ;;  %v213_v18 = vld [vmem:[%s1653_s28 + $0x120] sm:$0xff]  ;;  %v215_v19 = vld [vmem:[%s1653_s28 + $0x128] sm:$0xff] }
  0x27   : > { %196 = vst [vmem:[%s1658_s26 + $0x48] sm:$0xff] %v195_v9  ;;  %v217_v20 = vld [vmem:[%s1653_s28 + $0x140] sm:$0xff]  ;;  %v219_v21 = vld [vmem:[%s1653_s28 + $0x148] sm:$0xff] }
  0x28   : > { %198 = vst [vmem:[%s1658_s26 + $0x50] sm:$0xff] %v197_v10  ;;  %v221_v22 = vld [vmem:[%s1653_s28 + $0x160] sm:$0xff]  ;;  %v223_v23 = vld [vmem:[%s1653_s28 + $0x168] sm:$0xff] }
  0x29   : > { %200 = vst [vmem:[%s1658_s26 + $0x58] sm:$0xff] %v199_v11  ;;  %v225_v24 = vld [vmem:[%s1653_s28 + $0x180] sm:$0xff]  ;;  %v227_v25 = vld [vmem:[%s1653_s28 + $0x188] sm:$0xff] }
  0x2a   : > { %202 = vst [vmem:[%s1658_s26 + $0x60] sm:$0xff] %v201_v12  ;;  %v229_v26 = vld [vmem:[%s1653_s28 + $0x1a0] sm:$0xff]  ;;  %v231_v27 = vld [vmem:[%s1653_s28 + $0x1a8] sm:$0xff] }
  0x2b   : > { %204 = vst [vmem:[%s1658_s26 + $0x68] sm:$0xff] %v203_v13  ;;  %v233_v28 = vld [vmem:[%s1653_s28 + $0x1c0] sm:$0xff]  ;;  %v235_v29 = vld [vmem:[%s1653_s28 + $0x1c8] sm:$0xff] }
  0x2c   : > { %206 = vst [vmem:[%s1658_s26 + $0x70] sm:$0xff] %v205_v14  ;;  %v237_v30 = vld [vmem:[%s1653_s28 + $0x1e0] sm:$0xff]  ;;  %v239_v31 = vld [vmem:[%s1653_s28 + $0x1e8] sm:$0xff] }
  0x2d   : > { %208 = vst [vmem:[%s1658_s26 + $0x78] sm:$0xff] %v207_v15  ;;  %v241_v32 = vld [vmem:[%s1653_s28 + $0x200] sm:$0xff]  ;;  %v243_v33 = vld [vmem:[%s1653_s28 + $0x208] sm:$0xff] }
  0x2e   : > { %210 = vst [vmem:[%s1658_s26 + $0x80] sm:$0xff] %v209_v16  ;;  %v245_v34 = vld [vmem:[%s1653_s28 + $0x220] sm:$0xff]  ;;  %v247_v35 = vld [vmem:[%s1653_s28 + $0x228] sm:$0xff] }
  0x2f   : > { %212 = vst [vmem:[%s1658_s26 + $0x88] sm:$0xff] %v211_v17  ;;  %v249_v36 = vld [vmem:[%s1653_s28 + $0x240] sm:$0xff]  ;;  %v251_v37 = vld [vmem:[%s1653_s28 + $0x248] sm:$0xff] }
  0x30   : > { %214 = vst [vmem:[%s1658_s26 + $0x90] sm:$0xff] %v213_v18  ;;  %v253_v38 = vld [vmem:[%s1653_s28 + $0x260] sm:$0xff]  ;;  %v255_v39 = vld [vmem:[%s1653_s28 + $0x268] sm:$0xff] }
  0x31   : > { %216 = vst [vmem:[%s1658_s26 + $0x98] sm:$0xff] %v215_v19 }
  0x32   : > { %218 = vst [vmem:[%s1658_s26 + $0xa0] sm:$0xff] %v217_v20 }
  0x33   : > { %220 = vst [vmem:[%s1658_s26 + $0xa8] sm:$0xff] %v219_v21 }
  0x34   : > { %222 = vst [vmem:[%s1658_s26 + $0xb0] sm:$0xff] %v221_v22 }
  0x35   : > { %224 = vst [vmem:[%s1658_s26 + $0xb8] sm:$0xff] %v223_v23 }
  0x36   : > { %226 = vst [vmem:[%s1658_s26 + $0xc0] sm:$0xff] %v225_v24 }
  0x37   : > { %228 = vst [vmem:[%s1658_s26 + $0xc8] sm:$0xff] %v227_v25 }
  0x38   : > { %230 = vst [vmem:[%s1658_s26 + $0xd0] sm:$0xff] %v229_v26 }
  0x39   : > { %232 = vst [vmem:[%s1658_s26 + $0xd8] sm:$0xff] %v231_v27 }
  0x3a   : > { %234 = vst [vmem:[%s1658_s26 + $0xe0] sm:$0xff] %v233_v28 }
  0x3b   : > { %236 = vst [vmem:[%s1658_s26 + $0xe8] sm:$0xff] %v235_v29 }
  0x3c   : > { %238 = vst [vmem:[%s1658_s26 + $0xf0] sm:$0xff] %v237_v30 }
  0x3d   : > { %240 = vst [vmem:[%s1658_s26 + $0xf8] sm:$0xff] %v239_v31 }
  0x3e   : > { %242 = vst [vmem:[%s1658_s26 + $0x100] sm:$0xff] %v241_v32 }
  0x3f   : > { %244 = vst [vmem:[%s1658_s26 + $0x108] sm:$0xff] %v243_v33 }
  0x40   : > { %246 = vst [vmem:[%s1658_s26 + $0x110] sm:$0xff] %v245_v34 }
  0x41   : > { %248 = vst [vmem:[%s1658_s26 + $0x118] sm:$0xff] %v247_v35 }
  0x42   : > { %250 = vst [vmem:[%s1658_s26 + $0x120] sm:$0xff] %v249_v36 }
  0x43   : > { %252 = vst [vmem:[%s1658_s26 + $0x128] sm:$0xff] %v251_v37 }
  0x44   : > { %254 = vst [vmem:[%s1658_s26 + $0x130] sm:$0xff] %v253_v38 }
  0x45   : > { %256 = vst [vmem:[%s1658_s26 + $0x138] sm:$0xff] %v255_v39 }
  0x46 PF: > { %p1238_p0 = scmp.ge.s32.totalorder %s1530_s21, 1  ;;  %p261_p1 = scmp.lt.s32.totalorder %s1530_s21, 5 }
  0x48   : > { %p262_p2 = pnand %p1238_p0, %p261_p1 }
  0x4a   : > { %265 = sbr.rel (%p262_p2) target bundleno = 620 (0x26c), region = 51 }
  0x4f   : > { %s268_s27 = sand.u32 1, %s1506_s15   ;;  %p296_p3 = scmp.lt.s32.totalorder %s1514_s17, 1  ;;  %vm387_vm0 = vcmask 261120  }
  0x50   : > { %s1326_s29 = smul.u32 320, %s268_s27  ;;  %s293_s27 = sand.u32 1, %s1498_s13  }
  0x51   : > { %s1752_s15 = scalar_select %p296_p3, %s1514_s17, 1 }
  0x52   : > { %s1740_s4 = scalar_lea.vmem [#allocation2], %s1326_s29  ;;  %s1327_s29 = smul.u32 112, %s293_s27 }
  0x53   : > { %v377_v40 = vld [vmem:[%s1740_s4 + $0xf0] sm:$0xff]  ;;  %v378_v41 = vld [vmem:[%s1740_s4 + $0xf8] sm:$0xff]  ;;  %v375_v42 = vld [vmem:[%s1740_s4 + $0xe0] sm:$0xff]  ;;  %s1328_s5 = smul.u32 352, %s1752_s15  ;;  %s1121_s28 = scalar_lea.sflag [#allocation4], %s293_s27 }
  0x54   : > { %454 = vmatpush.msra.mxu0 %v377_v40  ;;  %620 = vmatpush.msra.mxu2 %v378_v41  ;;  %v376_v43 = vld [vmem:[%s1740_s4 + $0xe8] sm:$0xff]  ;;  %v373_v44 = vld [vmem:[%s1740_s4 + $0xd0] sm:$0xff]  ;;  %v374_v45 = vld [vmem:[%s1740_s4 + $0xd8] sm:$0xff]  ;;  %s1329_s15 = smul.u32 28, %s1514_s17 }
  0x55   : > { %v371_v46 = vld [vmem:[%s1740_s4 + $0xc0] sm:$0xff]  ;;  %v372_v47 = vld [vmem:[%s1740_s4 + $0xc8] sm:$0xff]  ;;  %v369_v48 = vld [vmem:[%s1740_s4 + $0xb0] sm:$0xff]  ;;  %s1772_s11 = scalar_lea.vmem %s2227_s0, %s1328_s5  ;;  %s1298_s5 = sshll.u32 %s1518_s18, 1 }
  0x56   : > { %455 = vmatpush.msra.mxu0 %v375_v42  ;;  %621 = vmatpush.msra.mxu2 %v376_v43  ;;  %v370_v49 = vld [vmem:[%s1740_s4 + $0xb8] sm:$0xff]  ;;  %v367_v50 = vld [vmem:[%s1740_s4 + $0xa0] sm:$0xff]  ;;  %v368_v51 = vld [vmem:[%s1740_s4 + $0xa8] sm:$0xff]  ;;  %s1132_s9 = sadd.s32 %s1329_s15, %s1298_s5 }
  0x57   : > { %v385_v52 = vld [vmem:[%s1740_s4 + $0x130] sm:$0xff]  ;;  %v386_v53 = vld [vmem:[%s1740_s4 + $0x138] sm:$0xff]  ;;  %v383_v54 = vld [vmem:[%s1740_s4 + $0x120] sm:$0xff]  ;;  %s1299_s10 = sshll.u32 %s1132_s9, 3  ;;  %s1440_s9 = scalar_lea.hbm %s2230_s3, 448 }
  0x58   : > { %456 = vmatpush.msra.mxu0 %v373_v44  ;;  %622 = vmatpush.msra.mxu2 %v374_v45  ;;  %v365_v55 = vld [vmem:[%s1740_s4 + $0x90] sm:$0xff]  ;;  %v366_v56 = vld [vmem:[%s1740_s4 + $0x98] sm:$0xff]  ;;  %v384_v57 = vld [vmem:[%s1740_s4 + $0x128] sm:$0xff]  ;;  %s1134_s23 = scalar_lea.hbm %s2230_s3, %s1299_s10 }
  0x59   : > { %549 = vmatpush.msra.mxu1 %v385_v52  ;;  %715 = vmatpush.msra.mxu3 %v386_v53  ;;  %v381_v58 = vld [vmem:[%s1740_s4 + $0x110] sm:$0xff]  ;;  %v382_v59 = vld [vmem:[%s1740_s4 + $0x118] sm:$0xff]  ;;  %v363_v60 = vld [vmem:[%s1740_s4 + $0x80] sm:$0xff]  ;;  %s1137_s18 = sshll.u32 %s1134_s23, 4  ;;  %s1138_s18 = int_to_ptr.hbm [resolvable:$true] %s1137_s18 }
  0x5a   : > { %457 = vmatpush.msra.mxu0 %v371_v46  ;;  %623 = vmatpush.msra.mxu2 %v372_v47  ;;  %v364_v61 = vld [vmem:[%s1740_s4 + $0x88] sm:$0xff]  ;;  %v379_v62 = vld [vmem:[%s1740_s4 + $0x100] sm:$0xff]  ;;  %v361_v0 = vld [vmem:[%s1740_s4 + $0x70] sm:$0xff]  ;;  %s1434_s26 = sshra.s32 %s1138_s18, 4  ;;  %s1435_s26 = int_to_ptr.hbm [resolvable:$true] %s1434_s26 }
  0x5b   : > { %550 = vmatpush.msra.mxu1 %v383_v54  ;;  %716 = vmatpush.msra.mxu3 %v384_v57  ;;  %v380_v63 = vld [vmem:[%s1740_s4 + $0x108] sm:$0xff]  ;;  %v362_v1 = vld [vmem:[%s1740_s4 + $0x78] sm:$0xff]  ;;  %v359_v3 = vld [vmem:[%s1740_s4 + $0x60] sm:$0xff]  ;;  %p1441_p8 = scmp.lt.s32.totalorder %s1435_s26, %s2230_s3 }
  0x5c   : > { %458 = vmatpush.msra.mxu0 %v369_v48  ;;  %624 = vmatpush.msra.mxu2 %v370_v49  ;;  %v304_v2 = vld [vmem:[%s1772_s11 + $0x8] sm:$0xff]  ;;  %v357_v5 = vld [vmem:[%s1740_s4 + $0x50] sm:$0xff]  ;;  %v358_v6 = vld [vmem:[%s1740_s4 + $0x58] sm:$0xff] }
  0x5d   : > { %551 = vmatpush.msra.mxu1 %v381_v58  ;;  %717 = vmatpush.msra.mxu3 %v382_v59  ;;  %v360_v4 = vld [vmem:[%s1740_s4 + $0x68] sm:$0xff]  ;;  %v355_v7 = vld [vmem:[%s1740_s4 + $0x40] sm:$0xff]  ;;  %v353_v9 = vld [vmem:[%s1740_s4 + $0x30] sm:$0xff] }
  0x5e   : > { %459 = vmatpush.msra.mxu0 %v367_v50  ;;  %625 = vmatpush.msra.mxu2 %v368_v51  ;;  %v356_v8 = vld [vmem:[%s1740_s4 + $0x48] sm:$0xff]  ;;  %v354_v10 = vld [vmem:[%s1740_s4 + $0x38] sm:$0xff]  ;;  %v351_v12 = vld [vmem:[%s1740_s4 + $0x20] sm:$0xff] }
  0x5f   : > { %552 = vmatpush.msra.mxu1 %v379_v62  ;;  %718 = vmatpush.msra.mxu3 %v380_v63  ;;  %v306_v11 = vld [vmem:[%s1772_s11 + $0x18] sm:$0xff]  ;;  %v352_v13 = vld [vmem:[%s1740_s4 + $0x28] sm:$0xff]  ;;  %v349_v14 = vld [vmem:[%s1740_s4 + $0x10] sm:$0xff] }
  0x60   : > { %460 = vmatpush.msra.mxu0 %v365_v55  ;;  %626 = vmatpush.msra.mxu2 %v366_v56  ;;  %v350_v15 = vld [vmem:[%s1740_s4 + $0x18] sm:$0xff]  ;;  %v347_v16 = vld [vmem:[%s1740_s4] sm:$0xff]  ;;  %v348_v17 = vld [vmem:[%s1740_s4 + $0x8] sm:$0xff]  ;;  %s2159_s4 = scalar_lea.vmem [#allocation3], %s1327_s29  ;;  %s1436_s29 = scalar_lea.hbm %s1435_s26, 112 }
  0x61   : > { %1240 = vmatmul.msk.f32.vlgmr.msra.gmra.mxu1 %vm387_vm0, %v304_v2  ;;  %1262 = vmatmul.msk.f32.vlgmr.msra.gmra.mxu3 %vm387_vm0, %v304_v2  ;;  %v303_v18 = vld [vmem:[%s1772_s11] sm:$0xff]  ;;  %v308_v19 = vld [vmem:[%s1772_s11 + $0x28] sm:$0xff]  ;;  %v305_v20 = vld [vmem:[%s1772_s11 + $0x10] sm:$0xff]  ;;  %s1135_s17 = sshll.u32 %s2159_s4, 4  ;;  %p1437_p4 = scmp.ne.s32.totalorder %s1435_s26, %s1436_s29  ;;  %s1136_s17 = int_to_ptr.vmem [resolvable:$true] %s1135_s17 }
  0x62   : > { %461 = vmatpush.msra.mxu0 %v363_v60  ;;  %627 = vmatpush.msra.mxu2 %v364_v61  ;;  %v310_v21 = vld [vmem:[%s1772_s11 + $0x38] sm:$0xff]  ;;  %v307_v22 = vld [vmem:[%s1772_s11 + $0x20] sm:$0xff]  ;;  %v312_v23 = vld [vmem:[%s1772_s11 + $0x48] sm:$0xff]  ;;  %p1442_p9 = scmp.lt.s32.totalorder %s1440_s9, %s1436_s29 }
  0x63   : > { %v309_v24 = vld [vmem:[%s1772_s11 + $0x30] sm:$0xff]  ;;  %v314_v25 = vld [vmem:[%s1772_s11 + $0x58] sm:$0xff]  ;;  %v311_v26 = vld [vmem:[%s1772_s11 + $0x40] sm:$0xff]  ;;  %p1438_p5 = pnand %p1437_p4, %p1627_p7 }
  0x64   : > { %462 = vmatpush.msra.mxu0 %v361_v0  ;;  %628 = vmatpush.msra.mxu2 %v362_v1  ;;  %v316_v27 = vld [vmem:[%s1772_s11 + $0x68] sm:$0xff]  ;;  %v313_v28 = vld [vmem:[%s1772_s11 + $0x50] sm:$0xff]  ;;  %v318_v29 = vld [vmem:[%s1772_s11 + $0x78] sm:$0xff]  ;;  %p1443_p10 = por %p1442_p9, %p1441_p8 }
  0x65   : > { %v315_v30 = vld [vmem:[%s1772_s11 + $0x60] sm:$0xff]  ;;  %v320_v31 = vld [vmem:[%s1772_s11 + $0x88] sm:$0xff]  ;;  %v317_v32 = vld [vmem:[%s1772_s11 + $0x70] sm:$0xff]  ;;  %p1439_p6 = pneg %p1438_p5 }
  0x66   : > { %463 = vmatpush.msra.mxu0 %v359_v3  ;;  %629 = vmatpush.msra.mxu2 %v360_v4  ;;  %v322_v33 = vld [vmem:[%s1772_s11 + $0x98] sm:$0xff]  ;;  %v319_v34 = vld [vmem:[%s1772_s11 + $0x80] sm:$0xff]  ;;  %v324_v35 = vld [vmem:[%s1772_s11 + $0xa8] sm:$0xff] }
  0x67   : > { %v321_v36 = vld [vmem:[%s1772_s11 + $0x90] sm:$0xff]  ;;  %v326_v37 = vld [vmem:[%s1772_s11 + $0xb8] sm:$0xff]  ;;  %v323_v38 = vld [vmem:[%s1772_s11 + $0xa0] sm:$0xff]  ;;  %p1444_p11 = pnand %p1443_p10, %p1439_p6 }
  0x68   : > { %464 = vmatpush.msra.mxu0 %v357_v5  ;;  %630 = vmatpush.msra.mxu2 %v358_v6  ;;  %v328_v39 = vld [vmem:[%s1772_s11 + $0xc8] sm:$0xff]  ;;  %v325_v40 = vld [vmem:[%s1772_s11 + $0xb0] sm:$0xff]  ;;  %v330_v41 = vld [vmem:[%s1772_s11 + $0xd8] sm:$0xff] }
  0x69   : > { %1241 = vmatmul.msk.f32.gmra.mxu1 %vm387_vm0, %v306_v11  ;;  %1263 = vmatmul.msk.f32.gmra.mxu3 %vm387_vm0, %v306_v11  ;;  %v327_v42 = vld [vmem:[%s1772_s11 + $0xc0] sm:$0xff]  ;;  %v332_v43 = vld [vmem:[%s1772_s11 + $0xe8] sm:$0xff]  ;;  %v329_v44 = vld [vmem:[%s1772_s11 + $0xd0] sm:$0xff] }
  0x6a   : > { %465 = vmatpush.msra.mxu0 %v355_v7  ;;  %631 = vmatpush.msra.mxu2 %v356_v8  ;;  %v334_v45 = vld [vmem:[%s1772_s11 + $0xf8] sm:$0xff]  ;;  %v331_v46 = vld [vmem:[%s1772_s11 + $0xe0] sm:$0xff]  ;;  %v336_v48 = vld [vmem:[%s1772_s11 + $0x108] sm:$0xff] }
  0x6b   : > { %v333_v49 = vld [vmem:[%s1772_s11 + $0xf0] sm:$0xff]  ;;  %v338_v52 = vld [vmem:[%s1772_s11 + $0x118] sm:$0xff]  ;;  %v335_v54 = vld [vmem:[%s1772_s11 + $0x100] sm:$0xff] }
  0x6c   : > { %466 = vmatpush.msra.mxu0 %v353_v9  ;;  %632 = vmatpush.msra.mxu2 %v354_v10  ;;  %v340_v57 = vld [vmem:[%s1772_s11 + $0x128] sm:$0xff]  ;;  %v337_v60 = vld [vmem:[%s1772_s11 + $0x110] sm:$0xff]  ;;  %v342_v63 = vld [vmem:[%s1772_s11 + $0x138] sm:$0xff] }
  0x6d   : > { %v339_v2 = vld [vmem:[%s1772_s11 + $0x120] sm:$0xff]  ;;  %v344_v5 = vld [vmem:[%s1772_s11 + $0x148] sm:$0xff]  ;;  %v341_v8 = vld [vmem:[%s1772_s11 + $0x130] sm:$0xff] }
  0x6e   : > { %467 = vmatpush.msra.mxu0 %v351_v12  ;;  %633 = vmatpush.msra.mxu2 %v352_v13  ;;  %v346_v11 = vld [vmem:[%s1772_s11 + $0x158] sm:$0xff] }
  0x70   : > { %468 = vmatpush.msra.mxu0 %v349_v14  ;;  %634 = vmatpush.msra.mxu2 %v350_v15  ;;  %v343_v14 = vld [vmem:[%s1772_s11 + $0x140] sm:$0xff] }
  0x71   : > { %1242 = vmatmul.msk.f32.gmra.mxu1 %vm387_vm0, %v308_v19  ;;  %1264 = vmatmul.msk.f32.gmra.mxu3 %vm387_vm0, %v308_v19  ;;  %v345_v19 = vld [vmem:[%s1772_s11 + $0x150] sm:$0xff] }
  0x72   : > { %469 = vmatpush.msra.mxu0 %v347_v16  ;;  %635 = vmatpush.msra.mxu2 %v348_v17 }
  0x73   : > { %470 = vmatmul.f32.vlgmr.msra.gmra.mxu0 %v303_v18  ;;  %636 = vmatmul.f32.vlgmr.msra.gmra.mxu2 %v303_v18 }
  0x79   : > { %1243 = vmatmul.msk.f32.gmra.mxu1 %vm387_vm0, %v310_v21  ;;  %1265 = vmatmul.msk.f32.gmra.mxu3 %vm387_vm0, %v310_v21 }
  0x7b   : > { %473 = vmatmul.f32.gmra.mxu0 %v305_v20  ;;  %639 = vmatmul.f32.gmra.mxu2 %v305_v20 }
  0x81   : > { %1244 = vmatmul.msk.f32.gmra.mxu1 %vm387_vm0, %v312_v23  ;;  %1266 = vmatmul.msk.f32.gmra.mxu3 %vm387_vm0, %v312_v23 }
  0x83   : > { %476 = vmatmul.f32.gmra.mxu0 %v307_v22  ;;  %642 = vmatmul.f32.gmra.mxu2 %v307_v22 }
  0x89   : > { %1245 = vmatmul.msk.f32.gmra.mxu1 %vm387_vm0, %v314_v25  ;;  %1267 = vmatmul.msk.f32.gmra.mxu3 %vm387_vm0, %v314_v25 }
  0x8b   : > { %479 = vmatmul.f32.gmra.mxu0 %v309_v24  ;;  %645 = vmatmul.f32.gmra.mxu2 %v309_v24 }
  0x91   : > { %1246 = vmatmul.msk.f32.gmra.mxu1 %vm387_vm0, %v316_v27  ;;  %1268 = vmatmul.msk.f32.gmra.mxu3 %vm387_vm0, %v316_v27 }
  0x93   : > { %482 = vmatmul.f32.gmra.mxu0 %v311_v26  ;;  %648 = vmatmul.f32.gmra.mxu2 %v311_v26 }
  0x99   : > { %1247 = vmatmul.msk.f32.gmra.mxu1 %vm387_vm0, %v318_v29  ;;  %1269 = vmatmul.msk.f32.gmra.mxu3 %vm387_vm0, %v318_v29 }
  0x9b   : > { %485 = vmatmul.f32.gmra.mxu0 %v313_v28  ;;  %651 = vmatmul.f32.gmra.mxu2 %v313_v28 }
  0xa1   : > { %1248 = vmatmul.msk.f32.gmra.mxu1 %vm387_vm0, %v320_v31  ;;  %1270 = vmatmul.msk.f32.gmra.mxu3 %vm387_vm0, %v320_v31 }
  0xa3   : > { %488 = vmatmul.f32.gmra.mxu0 %v315_v30  ;;  %654 = vmatmul.f32.gmra.mxu2 %v315_v30 }
  0xa9   : > { %1249 = vmatmul.msk.f32.gmra.mxu1 %vm387_vm0, %v322_v33  ;;  %1271 = vmatmul.msk.f32.gmra.mxu3 %vm387_vm0, %v322_v33 }
  0xab   : > { %491 = vmatmul.f32.gmra.mxu0 %v317_v32  ;;  %657 = vmatmul.f32.gmra.mxu2 %v317_v32 }
  0xb1   : > { %1250 = vmatmul.msk.f32.gmra.mxu1 %vm387_vm0, %v324_v35  ;;  %1272 = vmatmul.msk.f32.gmra.mxu3 %vm387_vm0, %v324_v35 }
  0xb3   : > { %494 = vmatmul.f32.gmra.mxu0 %v319_v34  ;;  %660 = vmatmul.f32.gmra.mxu2 %v319_v34 }
  0xb9   : > { %1251 = vmatmul.msk.f32.gmra.mxu1 %vm387_vm0, %v326_v37  ;;  %1273 = vmatmul.msk.f32.gmra.mxu3 %vm387_vm0, %v326_v37 }
  0xbb   : > { %497 = vmatmul.f32.gmra.mxu0 %v321_v36  ;;  %663 = vmatmul.f32.gmra.mxu2 %v321_v36 }
  0xc1   : > { %1252 = vmatmul.msk.f32.gmra.mxu1 %vm387_vm0, %v328_v39  ;;  %1274 = vmatmul.msk.f32.gmra.mxu3 %vm387_vm0, %v328_v39 }
  0xc3   : > { %500 = vmatmul.f32.gmra.mxu0 %v323_v38  ;;  %666 = vmatmul.f32.gmra.mxu2 %v323_v38 }
  0xc9   : > { %1253 = vmatmul.msk.f32.gmra.mxu1 %vm387_vm0, %v330_v41  ;;  %1275 = vmatmul.msk.f32.gmra.mxu3 %vm387_vm0, %v330_v41 }
  0xcb   : > { %503 = vmatmul.f32.gmra.mxu0 %v325_v40  ;;  %669 = vmatmul.f32.gmra.mxu2 %v325_v40 }
  0xd1   : > { %1254 = vmatmul.msk.f32.gmra.mxu1 %vm387_vm0, %v332_v43  ;;  %1276 = vmatmul.msk.f32.gmra.mxu3 %vm387_vm0, %v332_v43 }
  0xd3   : > { %506 = vmatmul.f32.gmra.mxu0 %v327_v42  ;;  %672 = vmatmul.f32.gmra.mxu2 %v327_v42 }
  0xd9   : > { %1255 = vmatmul.msk.f32.gmra.mxu1 %vm387_vm0, %v334_v45  ;;  %1277 = vmatmul.msk.f32.gmra.mxu3 %vm387_vm0, %v334_v45 }
  0xdb   : > { %509 = vmatmul.f32.gmra.mxu0 %v329_v44  ;;  %675 = vmatmul.f32.gmra.mxu2 %v329_v44 }
  0xde   : > { %v1855_v47 = vpop.f32.mrf.mxu1 }
  0xe1   : > { %1256 = vmatmul.msk.f32.gmra.mxu1 %vm387_vm0, %v336_v48  ;;  %1278 = vmatmul.msk.f32.gmra.mxu3 %vm387_vm0, %v336_v48 }
  0xe3   : > { %512 = vmatmul.f32.gmra.mxu0 %v331_v46  ;;  %678 = vmatmul.f32.gmra.mxu2 %v331_v46 }
  0xe4   : > { %v1861_v50 = vpop.f32.mrf.mxu3 }
  0xe5   : > { %2234 = vst [vmem:[#allocation6_spill] sm:$0xff] %v1861_v50 }
  0xe6   : > { %v1863_v51 = vpop.f32.mrf.mxu1 }
  0xe9   : > { %1257 = vmatmul.msk.f32.gmra.mxu1 %vm387_vm0, %v338_v52  ;;  %1279 = vmatmul.msk.f32.gmra.mxu3 %vm387_vm0, %v338_v52 }
  0xeb   : > { %515 = vmatmul.f32.gmra.mxu0 %v333_v49  ;;  %681 = vmatmul.f32.gmra.mxu2 %v333_v49 }
  0xec   : > { %v1871_v55 = vpop.f32.mrf.mxu3 }
  0xed   : > { %2235 = vst [vmem:[#allocation7_spill] sm:$0xff] %v1871_v55 }
  0xee   : > { %v1873_v56 = vpop.f32.mrf.mxu1 }
  0xf0   : > { %v1868_v53 = vpop.f32.mrf.mxu0 }
  0xf1   : > { %1258 = vmatmul.msk.f32.gmra.mxu1 %vm387_vm0, %v340_v57  ;;  %1280 = vmatmul.msk.f32.gmra.mxu3 %vm387_vm0, %v340_v57 }
  0xf3   : > { %518 = vmatmul.f32.gmra.mxu0 %v335_v54  ;;  %684 = vmatmul.f32.gmra.mxu2 %v335_v54 }
  0xf4   : > { %v1883_v61 = vpop.f32.mrf.mxu3 }
  0xf5   : > { %2237 = vst [vmem:[#allocation9_spill] sm:$0xff] %v1883_v61 }
  0xf6   : > { %v1878_v58 = vpop.f32.mrf.mxu2  ;;  %v1885_v62 = vpop.f32.mrf.mxu1 }
  0xf7   : > { %2236 = vst [vmem:[#allocation8_spill] sm:$0xff] %v1878_v58 }
  0xf8   : > { %v1880_v59 = vpop.f32.mrf.mxu0 }
  0xf9   : > { %1259 = vmatmul.msk.f32.gmra.mxu1 %vm387_vm0, %v342_v63  ;;  %1281 = vmatmul.msk.f32.gmra.mxu3 %vm387_vm0, %v342_v63 }
  0xfb   : > { %521 = vmatmul.f32.gmra.mxu0 %v337_v60  ;;  %687 = vmatmul.f32.gmra.mxu2 %v337_v60 }
  0xfc   : > { %v1895_v3 = vpop.f32.mrf.mxu3 }
  0xfd   : > { %2239 = vst [vmem:[#allocation11_spill] sm:$0xff] %v1895_v3 }
  0xfe   : > { %v1890_v0 = vpop.f32.mrf.mxu2  ;;  %v1897_v4 = vpop.f32.mrf.mxu1 }
  0xff   : > { %2238 = vst [vmem:[#allocation10_spill] sm:$0xff] %v1890_v0 }
 0x100   : > { %v1892_v1 = vpop.f32.mrf.mxu0 }
 0x101   : > { %1260 = vmatmul.msk.f32.gmra.mxu1 %vm387_vm0, %v344_v5  ;;  %1282 = vmatmul.msk.f32.gmra.mxu3 %vm387_vm0, %v344_v5 }
 0x103   : > { %524 = vmatmul.f32.gmra.mxu0 %v339_v2  ;;  %690 = vmatmul.f32.gmra.mxu2 %v339_v2 }
 0x104   : > { %v1907_v9 = vpop.f32.mrf.mxu3 }
 0x106   : > { %v1902_v6 = vpop.f32.mrf.mxu2  ;;  %v1909_v10 = vpop.f32.mrf.mxu1 }
 0x107   : > { %2240 = vst [vmem:[#allocation12_spill] sm:$0xff] %v1902_v6 }
 0x108   : > { %v1904_v7 = vpop.f32.mrf.mxu0 }
 0x109   : > { %1261 = vmatmul.msk.f32.gmra.mxu1 %vm387_vm0, %v346_v11  ;;  %1283 = vmatmul.msk.f32.gmra.mxu3 %vm387_vm0, %v346_v11 }
 0x10b   : > { %527 = vmatmul.f32.gmra.mxu0 %v341_v8  ;;  %693 = vmatmul.f32.gmra.mxu2 %v341_v8 }
 0x10c   : > { %v1919_v15 = vpop.f32.mrf.mxu3 }
 0x10e   : > { %v1914_v12 = vpop.f32.mrf.mxu2  ;;  %v572_v16 = vpop.f32.mrf.mxu1 }
 0x110   : > { %v1916_v13 = vpop.f32.mrf.mxu0 }
 0x113   : > { %530 = vmatmul.f32.gmra.mxu0 %v343_v14  ;;  %696 = vmatmul.f32.gmra.mxu2 %v343_v14 }
 0x114   : > { %v738_v20 = vpop.f32.mrf.mxu3 }
 0x116   : > { %v1921_v17 = vpop.f32.mrf.mxu2  ;;  %v575_v21 = vpop.f32.mrf.mxu1 }
 0x118   : > { %v1923_v18 = vpop.f32.mrf.mxu0 }
 0x11b   : > { %533 = vmatmul.f32.gmra.mxu0 %v345_v19  ;;  %699 = vmatmul.f32.gmra.mxu2 %v345_v19 }
 0x11c   : > { %v741_v24 = vpop.f32.mrf.mxu3 }
 0x11e   : > { %v1926_v22 = vpop.f32.mrf.mxu2  ;;  %v578_v26 = vpop.f32.mrf.mxu1 }
 0x120   : > { %v489_v23 = vpop.f32.mrf.mxu0 }
 0x121   : > { %v1928_v25 = vadd.f32 %v572_v16, %v489_v23 }
 0x123   : > { %vm798_vm0 = vcmp.gt.f32.partialorder %v1928_v25, 1.0 }
 0x124   : > { %v744_v30 = vpop.f32.mrf.mxu3 }
 0x126   : > { %v655_v27 = vpop.f32.mrf.mxu2  ;;  %v581_v32 = vpop.f32.mrf.mxu1 }
 0x127   : > { %v1930_v28 = vadd.f32 %v738_v20, %v655_v27 }
 0x128   : > { %v492_v29 = vpop.f32.mrf.mxu0 }
 0x129   : > { %v1932_v31 = vadd.f32 %v575_v21, %v492_v29 }
 0x12b   : > { %vm800_vm14 = vcmp.gt.f32.partialorder %v1932_v31, 1.0 }
 0x12c   : > { %v1936_v36 = vpop.f32.mrf.mxu3 }
 0x12e   : > { %v658_v33 = vpop.f32.mrf.mxu2  ;;  %v584_v38 = vpop.f32.mrf.mxu1 }
 0x12f   : > { %v1934_v34 = vadd.f32 %v741_v24, %v658_v33 }
 0x130   : > { %v495_v35 = vpop.f32.mrf.mxu0 }
 0x131   : > { %v1938_v37 = vadd.f32 %v578_v26, %v495_v35 }
 0x133   : > { %vm802_vm12 = vcmp.gt.f32.partialorder %v1938_v37, 1.0 }
 0x134   : > { %v1942_v42 = vpop.f32.mrf.mxu3 }
 0x136   : > { %v661_v39 = vpop.f32.mrf.mxu2  ;;  %v587_v43 = vpop.f32.mrf.mxu1 }
 0x137   : > { %v1940_v40 = vadd.f32 %v744_v30, %v661_v39 }
 0x138   : > { %v498_v41 = vpop.f32.mrf.mxu0 }
 0x13c   : > { %v753_v46 = vpop.f32.mrf.mxu3 }
 0x13e   : > { %v1944_v44 = vpop.f32.mrf.mxu2  ;;  %v590_v48 = vpop.f32.mrf.mxu1 }
 0x140   : > { %v501_v45 = vpop.f32.mrf.mxu0 }
 0x141   : > { %v585_v6 = vadd.f32 %v584_v38, %v501_v45 }
 0x143   : > { %vm806_vm8 = vcmp.gt.f32.partialorder %v585_v6, 1.0 }
 0x144   : > { %v756_v54 = vpop.f32.mrf.mxu3 }
 0x146   : > { %v1946_v49 = vpop.f32.mrf.mxu2  ;;  %v593_v57 = vpop.f32.mrf.mxu1 }
 0x148   : > { %v504_v52 = vpop.f32.mrf.mxu0 }
 0x149   : > { %v588_v58 = vadd.f32 %v587_v43, %v504_v52 }
 0x14b   : > { %v852_v43 = vmul.f32 -0.1795, %v588_v58  ;;  %vm808_vm6 = vcmp.gt.f32.partialorder %v588_v58, 1.0 }
 0x14c   : > { %v759_v2 = vpop.f32.mrf.mxu3 }
 0x14e   : > { %v670_v60 = vpop.f32.mrf.mxu2  ;;  %v596_v5 = vpop.f32.mrf.mxu1 }
 0x14f   : > { %v754_v45 = vadd.f32 %v753_v46, %v670_v60  ;;  %v846_v60 = vmul.f32 -0.1795, %v1938_v37 }
 0x150   : > { %v507_v63 = vpop.f32.mrf.mxu0 }
 0x151   : > { %v591_v35 = vadd.f32 %v590_v48, %v507_v63  ;;  %vm809_vm13 = vcmp.gt.f32.partialorder %v754_v45, 1.0 }
 0x153   : > { %vm810_vm4 = vcmp.gt.f32.partialorder %v591_v35, 1.0 }
 0x154   : > { %v762_v14 = vpop.f32.mrf.mxu3 }
 0x156   : > { %v673_v8 = vpop.f32.mrf.mxu2  ;;  %v599_v16 = vpop.f32.mrf.mxu1 }
 0x157   : > { %v757_v48 = vadd.f32 %v756_v54, %v673_v8  ;;  %v896_v54 = vsel %vm808_vm6, %v588_v58, %v852_v43 }
 0x158   : > { %v510_v11 = vpop.f32.mrf.mxu0 }
 0x159   : > { %v594_v29 = vadd.f32 %v593_v57, %v510_v11  ;;  %vm811_vm11 = vcmp.gt.f32.partialorder %v757_v48, 1.0 }
 0x15b   : > { %v856_v61 = vmul.f32 -0.1795, %v594_v29  ;;  %vm812_vm3 = vcmp.gt.f32.partialorder %v594_v29, 1.0 }
 0x15c   : > { %v765_v21 = vpop.f32.mrf.mxu3 }
 0x15d   : > { %v900_v52 = vsel %vm812_vm3, %v594_v29, %v856_v61  ;;  %v751_v61 = vadd.f32 %v1942_v42, %v1946_v49  ;;  %v853_v42 = vmul.f32 -0.1795, %v754_v45  ;;  %vm803_vm3 = vcmp.gt.f32.partialorder %v1940_v40, 1.0 }
 0x15e   : > { %v676_v19 = vpop.f32.mrf.mxu2  ;;  %v1948_v23 = vpop.f32.mrf.mxu1 }
 0x15f   : > { %2241 = vst [vmem:[#allocation13_spill] sm:$0xff] %v1948_v23  ;;  %vm807_vm15 = vcmp.gt.f32.partialorder %v751_v61, 1.0 }
 0x160   : > { %v513_v20 = vpop.f32.mrf.mxu0 }
 0x161   : > { %v597_v26 = vadd.f32 %v596_v5, %v513_v20  ;;  %v760_v5 = vadd.f32 %v759_v2, %v676_v19  ;;  %v582_v20 = vadd.f32 %v581_v32, %v498_v41  ;;  %v855_v19 = vmul.f32 -0.1795, %v757_v48 }
 0x163   : > { %v858_v50 = vmul.f32 -0.1795, %v597_v26  ;;  %vm814_vm2 = vcmp.gt.f32.partialorder %v597_v26, 1.0  ;;  %vm813_vm9 = vcmp.gt.f32.partialorder %v760_v5, 1.0  ;;  %v848_v32 = vmul.f32 -0.1795, %v582_v20 }
 0x164   : > { %v1950_v33 = vpop.f32.mrf.mxu3  ;;  %vm804_vm10 = vcmp.gt.f32.partialorder %v582_v20, 1.0  ;;  %v1981_v29 = vsel %vm811_vm11, %v757_v48, %v855_v19  ;;  %v2246_v19 = vld [vmem:[#allocation7_spill] sm:$0xff] }
 0x165   : > { %v902_v11 = vsel %vm814_vm2, %v597_v26, %v858_v50  ;;  %v857_v50 = vmul.f32 -0.1795, %v760_v5 }
 0x166   : > { %v679_v24 = vpop.f32.mrf.mxu2  ;;  %v1952_v23 = vpop.f32.mrf.mxu1 }
 0x167   : > { %v763_v55 = vadd.f32 %v762_v14, %v679_v24  ;;  %v1971_v26 = vsel %vm813_vm9, %v760_v5, %v857_v50 }
 0x168   : > { %v516_v27 = vpop.f32.mrf.mxu0 }
 0x169   : > { %v600_v30 = vadd.f32 %v599_v16, %v516_v27  ;;  %v854_v16 = vmul.f32 -0.1795, %v591_v35  ;;  %v859_v38 = vmul.f32 -0.1795, %v763_v55  ;;  %vm815_vm7 = vcmp.gt.f32.partialorder %v763_v55, 1.0 }
 0x16a   : > { %v892_v27 = vsel %vm804_vm10, %v582_v20, %v848_v32 }
 0x16b   : > { %vm816_vm1 = vcmp.gt.f32.partialorder %v600_v30, 1.0  ;;  %v860_v39 = vmul.f32 -0.1795, %v600_v30  ;;  %v898_v2 = vsel %vm810_vm4, %v591_v35, %v854_v16  ;;  %v1963_v8 = vsel %vm815_vm7, %v763_v55, %v859_v38 }
 0x16c   : > { %v1959_v41 = vpop.f32.mrf.mxu3  ;;  %v570_v55 = vadd.f32 %v1909_v10, %v1923_v18  ;;  %v890_v10 = vsel %vm802_vm12, %v1938_v37, %v846_v60  ;;  %v1989_v18 = vsel %vm809_vm13, %v754_v45, %v853_v42  ;;  %v847_v37 = vmul.f32 -0.1795, %v1940_v40  ;;  %v2244_v45 = vld [vmem:[#allocation9_spill] sm:$0xff] }
 0x16d   : > { %v904_v0 = vsel %vm816_vm1, %v600_v30, %v860_v39  ;;  %v842_v30 = vmul.f32 -0.1795, %v1928_v25  ;;  %v564_v39 = vadd.f32 %v1885_v62, %v1904_v7  ;;  %vm799_vm7 = vcmp.gt.f32.partialorder %v1930_v28, 1.0 }
 0x16e   : > { %v682_v3 = vpop.f32.mrf.mxu2  ;;  %954 = vmatpush.msrb.mxu1 %v904_v0  ;;  %v850_v0 = vmul.f32 -0.1795, %v585_v6  ;;  %v1979_v49 = vpop.f32.mrf.mxu1  ;;  %v840_v5 = vmul.f32 -0.1795, %v570_v55  ;;  %vm796_vm2 = vcmp.gt.f32.partialorder %v570_v55, 1.0 }
 0x16f   : > { %v766_v57 = vadd.f32 %v765_v21, %v682_v3  ;;  %v748_v21 = vadd.f32 %v1936_v36, %v1944_v44  ;;  %v851_v36 = vmul.f32 -0.1795, %v751_v61  ;;  %v567_v44 = vadd.f32 %v1897_v4, %v1916_v13 }
 0x170   : > { %v1954_v63 = vpop.f32.mrf.mxu0  ;;  %955 = vmatpush.msrb.mxu1 %v902_v11  ;;  %v894_v24 = vsel %vm806_vm8, %v585_v6, %v850_v0  ;;  %v844_v6 = vmul.f32 -0.1795, %v1932_v31  ;;  %v886_v16 = vsel %vm798_vm0, %v1928_v25, %v842_v30  ;;  %v836_v43 = vmul.f32 -0.1795, %v564_v39 }
 0x171   : > { %vm817_vm5 = vcmp.gt.f32.partialorder %v766_v57, 1.0  ;;  %v861_v14 = vmul.f32 -0.1795, %v766_v57  ;;  %v849_v35 = vmul.f32 -0.1795, %v748_v21  ;;  %vm805_vm1 = vcmp.gt.f32.partialorder %v748_v21, 1.0 }
 0x172   : > { %956 = vmatpush.msrb.mxu1 %v900_v52  ;;  %v888_v4 = vsel %vm800_vm14, %v1932_v31, %v844_v6  ;;  %v1997_v13 = vsel %vm807_vm15, %v751_v61, %v851_v36  ;;  %v838_v62 = vmul.f32 -0.1795, %v567_v44  ;;  %v736_v31 = vadd.f32 %v1919_v15, %v1926_v22  ;;  %v2248_v6 = vld [vmem:[#allocation6_spill] sm:$0xff] }
 0x173   : > { %v1956_v3 = vsel %vm817_vm5, %v766_v57, %v861_v14  ;;  %v561_v57 = vadd.f32 %v1873_v56, %v1892_v1  ;;  %v2011_v20 = vsel %vm805_vm1, %v748_v21, %v849_v35  ;;  %v845_v56 = vmul.f32 -0.1795, %v1934_v34 }
 0x174   : > { %957 = vmatpush.msrb.mxu1 %v898_v2  ;;  %1030 = vmatpush.msrb.mxu0 %v1956_v3  ;;  %v2006_v7 = vpop.f32.mrf.mxu3  ;;  %v558_v1 = vadd.f32 %v1863_v51, %v1880_v59  ;;  %vm794_vm4 = vcmp.gt.f32.partialorder %v567_v44, 1.0  ;;  %vm801_vm5 = vcmp.gt.f32.partialorder %v1934_v34, 1.0  ;;  %v733_v15 = vadd.f32 %v1907_v9, %v1921_v17  ;;  %v2242_v17 = vld [vmem:[#allocation11_spill] sm:$0xff] }
 0x175   : > { %v884_v22 = vsel %vm796_vm2, %v570_v55, %v840_v5  ;;  %v2026_v25 = vsel %vm803_vm3, %v1940_v40, %v847_v37  ;;  %v843_v51 = vmul.f32 -0.1795, %v1930_v28  ;;  %v555_v59 = vadd.f32 %v1855_v47, %v1868_v53  ;;  %v2243_v53 = vld [vmem:[#allocation12_spill] sm:$0xff] }
 0x176   : > { %v1965_v46 = vpop.f32.mrf.mxu2  ;;  %958 = vmatpush.msrb.mxu1 %v896_v54  ;;  %1031 = vmatpush.msrb.mxu0 %v1963_v8  ;;  %vm792_vm6 = vcmp.gt.f32.partialorder %v564_v39, 1.0  ;;  %v2033_v52 = vpop.f32.mrf.mxu1  ;;  %v834_v9 = vmul.f32 -0.1795, %v561_v57  ;;  %v730_v14 = vadd.f32 %v2242_v17, %v1914_v12  ;;  %v882_v38 = vsel %vm794_vm4, %v567_v44, %v838_v62  ;;  %v2245_v54 = vld [vmem:[#allocation10_spill] sm:$0xff] }
 0x177   : > { %v2038_v40 = vsel %vm801_vm5, %v1934_v34, %v845_v56  ;;  %v841_v0 = vmul.f32 -0.1795, %v736_v31  ;;  %vm790_vm8 = vcmp.gt.f32.partialorder %v561_v57, 1.0  ;;  %vm797_vm9 = vcmp.gt.f32.partialorder %v736_v31, 1.0 }
 0x178   : > { %v1975_v58 = vpop.f32.mrf.mxu0  ;;  %959 = vmatpush.msrb.mxu1 %v894_v24  ;;  %1032 = vmatpush.msrb.mxu0 %v1971_v26  ;;  %v832_v47 = vmul.f32 -0.1795, %v558_v1  ;;  %v727_v2 = vadd.f32 %v2244_v45, %v2243_v53  ;;  %v880_v50 = vsel %vm792_vm6, %v564_v39, %v836_v43  ;;  %v2044_v32 = vsel %vm799_vm7, %v1930_v28, %v843_v51 }
 0x179   : > { %v839_v61 = vmul.f32 -0.1795, %v733_v15  ;;  %vm788_vm10 = vcmp.gt.f32.partialorder %v558_v1, 1.0  ;;  %vm795_vm11 = vcmp.gt.f32.partialorder %v733_v15, 1.0  ;;  %v830_v34 = vmul.f32 -0.1795, %v555_v59 }
 0x17a   : > { %960 = vmatpush.msrb.mxu1 %v892_v27  ;;  %1033 = vmatpush.msrb.mxu0 %v1981_v29  ;;  %v724_v60 = vadd.f32 %v2246_v19, %v2245_v54  ;;  %v878_v21 = vsel %vm790_vm8, %v561_v57, %v834_v9  ;;  %v2051_v24 = vsel %vm797_vm9, %v736_v31, %v841_v0  ;;  %v837_v42 = vmul.f32 -0.1795, %v730_v14  ;;  %v2247_v27 = vld [vmem:[#allocation8_spill] sm:$0xff] }
 0x17b   : > { %vm786_vm12 = vcmp.gt.f32.partialorder %v555_v59, 1.0  ;;  %vm793_vm13 = vcmp.gt.f32.partialorder %v730_v14, 1.0  ;;  %v721_v36 = vadd.f32 %v2248_v6, %v2247_v27  ;;  %v876_v44 = vsel %vm788_vm10, %v558_v1, %v832_v47  ;;  %v921_v27 = vld [vmem:[%s2229_s2 + $0x18] sm:$0xff]  ;;  %v926_v6 = vld [vmem:[%s2229_s2 + $0x40] sm:$0xff] }
 0x17c   : > { %961 = vmatpush.msrb.mxu1 %v890_v10  ;;  %1034 = vmatpush.msrb.mxu0 %v1989_v18  ;;  %v777_v28 = vpop.f32.mrf.mxu3  ;;  %v2056_v10 = vsel %vm795_vm11, %v733_v15, %v839_v61  ;;  %v835_v30 = vmul.f32 -0.1795, %v727_v2  ;;  %vm791_vm14 = vcmp.gt.f32.partialorder %v727_v2, 1.0  ;;  %v874_v35 = vsel %vm786_vm12, %v555_v59, %v830_v34 }
 0x17d   : > { %v2059_v39 = vsel %vm793_vm13, %v730_v14, %v837_v42  ;;  %vm789_vm15 = vcmp.gt.f32.partialorder %v724_v60, 1.0  ;;  %v831_v57 = vmul.f32 -0.1795, %v721_v36  ;;  %vm787_vm0 = vcmp.gt.f32.partialorder %v721_v36, 1.0  ;;  %v924_v42 = vld [vmem:[%s2229_s2 + $0x30] sm:$0xff] }
 0x17e   : > { %v2002_v11 = vpop.f32.mrf.mxu2  ;;  %962 = vmatpush.msrb.mxu1 %v888_v4  ;;  %1035 = vmatpush.msrb.mxu0 %v1997_v13  ;;  %v833_v4 = vmul.f32 -0.1795, %v724_v60  ;;  %v614_v5 = vpop.f32.mrf.mxu1  ;;  %v2063_v37 = vsel %vm791_vm14, %v727_v2, %v835_v30  ;;  %v606_v17 = vadd.f32 %v1952_v23, %v1975_v58  ;;  %v769_v34 = vadd.f32 %v1950_v33, %v1965_v46  ;;  %v930_v30 = vld [vmem:[%s2229_s2 + $0x60] sm:$0xff] }
 0x17f   : > { %vm932_vm11 = vcmask 392192  }
 0x180   : > { %v2016_v48 = vpop.f32.mrf.mxu0  ;;  %963 = vmatpush.msrb.mxu1 %v886_v16  ;;  %1036 = vmatpush.msrb.mxu0 %v2011_v20  ;;  %v2067_v31 = vsel %vm789_vm15, %v724_v60, %v833_v4  ;;  %v918_v16 = vld [vmem:[%s2229_s2] sm:$0xff]  ;;  %v864_v53 = vmul.f32 -0.1795, %v606_v17  ;;  %vm820_vm6 = vcmp.gt.f32.partialorder %v606_v17, 1.0  ;;  %v863_v46 = vmul.f32 -0.1795, %v769_v34 }
 0x181   : > { %vm819_vm13 = vcmp.gt.f32.partialorder %v769_v34, 1.0  ;;  %v931_v4 = vld [vmem:[%s2229_s2 + $0x68] sm:$0xff] }
 0x182   : > { %964 = vmatpush.msrb.mxu1 %v884_v22  ;;  %1037 = vmatpush.msrb.mxu0 %v2026_v25  ;;  %v908_v54 = vsel %vm820_vm6, %v606_v17, %v864_v53 }
 0x184   : > { %965 = vmatpush.msrb.mxu1 %v882_v38  ;;  %1038 = vmatpush.msrb.mxu0 %v2038_v40  ;;  %v780_v1 = vpop.f32.mrf.mxu3 }
 0x186   : > { %v2046_v12 = vpop.f32.mrf.mxu2  ;;  %966 = vmatpush.msrb.mxu1 %v880_v50  ;;  %1039 = vmatpush.msrb.mxu0 %v2044_v32  ;;  %v617_v15 = vpop.f32.mrf.mxu1 }
 0x188   : > { %v528_v55 = vpop.f32.mrf.mxu0  ;;  %967 = vmatpush.msrb.mxu1 %v878_v21  ;;  %1040 = vmatpush.msrb.mxu0 %v2051_v24 }
 0x189   : > { %v612_v51 = vadd.f32 %v2033_v52, %v528_v55 }
 0x18a   : > { %968 = vmatpush.msrb.mxu1 %v876_v44  ;;  %1041 = vmatpush.msrb.mxu0 %v2056_v10  ;;  %v928_v44 = vld [vmem:[%s2229_s2 + $0x50] sm:$0xff] }
 0x18b   : > { %v868_v38 = vmul.f32 -0.1795, %v612_v51  ;;  %vm824_vm3 = vcmp.gt.f32.partialorder %v612_v51, 1.0 }
 0x18c   : > { %969 = vmatpush.msrb.mxu1 %v874_v35  ;;  %1042 = vmatpush.msrb.mxu0 %v2059_v39  ;;  %v927_v35 = vld [vmem:[%s2229_s2 + $0x48] sm:$0xff] }
 0x18d   : > { %970 = vmatmul.f32.vlgmr.msrb.gmra.mxu1 %v918_v16  ;;  %v912_v45 = vsel %vm824_vm3, %v612_v51, %v868_v38 }
 0x18e   : > { %1303 = vmatpush.msra.mxu1 %v1956_v3  ;;  %v694_v62 = vpop.f32.mrf.mxu2  ;;  %1043 = vmatpush.msrb.mxu0 %v2063_v37  ;;  %v2074_v3 = vsel %vm787_vm0, %v721_v36, %v831_v57  ;;  %v923_v36 = vld [vmem:[%s2229_s2 + $0x28] sm:$0xff] }
 0x18f   : > { %v778_v0 = vadd.f32 %v777_v28, %v694_v62  ;;  %v907_v28 = vsel %vm819_vm13, %v769_v34, %v863_v46 }
 0x190   : > { %1304 = vmatpush.msra.mxu1 %v1963_v8  ;;  %v531_v56 = vpop.f32.mrf.mxu0  ;;  %1044 = vmatpush.msrb.mxu0 %v2067_v31  ;;  %v920_v8 = vld [vmem:[%s2229_s2 + $0x10] sm:$0xff] }
 0x191   : > { %v615_v22 = vadd.f32 %v614_v5, %v531_v56  ;;  %vm825_vm9 = vcmp.gt.f32.partialorder %v778_v0, 1.0 }
 0x192   : > { %1305 = vmatpush.msra.mxu1 %v1971_v26  ;;  %1045 = vmatpush.msrb.mxu0 %v2074_v3 }
 0x193   : > { %1046 = vmatmul.f32.vlgmr.msrb.gmra.mxu0 %v918_v16  ;;  %v870_v9 = vmul.f32 -0.1795, %v615_v22  ;;  %vm826_vm2 = vcmp.gt.f32.partialorder %v615_v22, 1.0 }
 0x194   : > { %1306 = vmatpush.msra.mxu1 %v1981_v29  ;;  %v609_v29 = vadd.f32 %v1979_v49, %v2016_v48  ;;  %v922_v49 = vld [vmem:[%s2229_s2 + $0x20] sm:$0xff] }
 0x195   : > { %973 = vmatmul.f32.gmra.mxu1 %v920_v8  ;;  %v914_v23 = vsel %vm826_vm2, %v615_v22, %v870_v9 }
 0x196   : > { %1307 = vmatpush.msra.mxu1 %v1989_v18  ;;  %v697_v43 = vpop.f32.mrf.mxu2  ;;  %v866_v58 = vmul.f32 -0.1795, %v609_v29  ;;  %vm822_vm4 = vcmp.gt.f32.partialorder %v609_v29, 1.0 }
 0x197   : > { %v781_v14 = vadd.f32 %v780_v1, %v697_v43 }
 0x198   : > { %1308 = vmatpush.msra.mxu1 %v1997_v13  ;;  %v534_v26 = vpop.f32.mrf.mxu0  ;;  %v783_v13 = vpop.f32.mrf.mxu3 }
 0x199   : > { %v618_v59 = vadd.f32 %v617_v15, %v534_v26  ;;  %v871_v2 = vmul.f32 -0.1795, %v781_v14  ;;  %vm827_vm7 = vcmp.gt.f32.partialorder %v781_v14, 1.0 }
 0x19a   : > { %1309 = vmatpush.msra.mxu1 %v2011_v20  ;;  %v2249_v20 = vld [vmem:[#allocation13_spill] sm:$0xff] }
 0x19b   : > { %vm828_vm1 = vcmp.gt.f32.partialorder %v618_v59, 1.0  ;;  %v872_v18 = vmul.f32 -0.1795, %v618_v59  ;;  %1049 = vmatmul.f32.gmra.mxu0 %v920_v8  ;;  %v603_v48 = vadd.f32 %v2249_v20, %v1954_v63  ;;  %v915_v19 = vsel %vm827_vm7, %v781_v14, %v871_v2 }
 0x19c   : > { %1310 = vmatpush.msra.mxu1 %v2026_v25 }
 0x19d   : > { %v916_v52 = vsel %vm828_vm1, %v618_v59, %v872_v18  ;;  %976 = vmatmul.f32.gmra.mxu1 %v922_v49  ;;  %v862_v50 = vmul.f32 -0.1795, %v603_v48  ;;  %vm818_vm8 = vcmp.gt.f32.partialorder %v603_v48, 1.0 }
 0x19e   : > { %1311 = vmatpush.msra.mxu1 %v2038_v40  ;;  %v700_v25 = vpop.f32.mrf.mxu2  ;;  %1002 = vmatpush.msrb.mxu3 %v916_v52  ;;  %v775_v40 = vadd.f32 %v2006_v7, %v2046_v12  ;;  %v910_v7 = vsel %vm822_vm4, %v609_v29, %v866_v58  ;;  %v869_v12 = vmul.f32 -0.1795, %v778_v0 }
 0x19f   : > { %v784_v47 = vadd.f32 %v783_v13, %v700_v25 }
 0x1a0   : > { %1312 = vmatpush.msra.mxu1 %v2044_v32  ;;  %1003 = vmatpush.msrb.mxu3 %v914_v23  ;;  %v772_v32 = vadd.f32 %v1959_v41, %v2002_v11  ;;  %v867_v60 = vmul.f32 -0.1795, %v775_v40  ;;  %vm823_vm10 = vcmp.gt.f32.partialorder %v775_v40, 1.0  ;;  %v906_v41 = vsel %vm818_vm8, %v603_v48, %v862_v50 }
 0x1a1   : > { %vm829_vm5 = vcmp.gt.f32.partialorder %v784_v47, 1.0  ;;  %v873_v63 = vmul.f32 -0.1795, %v784_v47  ;;  %v913_v11 = vsel %vm825_vm9, %v778_v0, %v869_v12 }
 0x1a2   : > { %1313 = vmatpush.msra.mxu1 %v2051_v24  ;;  %1004 = vmatpush.msrb.mxu3 %v912_v45  ;;  %v865_v21 = vmul.f32 -0.1795, %v772_v32  ;;  %v919_v24 = vld [vmem:[%s2229_s2 + $0x8] sm:$0xff]  ;;  %vm821_vm12 = vcmp.gt.f32.partialorder %v772_v32, 1.0  ;;  %v911_v33 = vsel %vm823_vm10, %v775_v40, %v867_v60 }
 0x1a3   : > { %v917_v61 = vsel %vm829_vm5, %v784_v47, %v873_v63  ;;  %1052 = vmatmul.f32.gmra.mxu0 %v922_v49 }
 0x1a4   : > { %1314 = vmatpush.msra.mxu1 %v2056_v10  ;;  %1005 = vmatpush.msrb.mxu3 %v910_v7  ;;  %v909_v55 = vsel %vm821_vm12, %v772_v32, %v865_v21  ;;  %v925_v10 = vld [vmem:[%s2229_s2 + $0x38] sm:$0xff] }
 0x1a5   : > { %1078 = vmatpush.msrb.mxu2 %v917_v61  ;;  %979 = vmatmul.f32.gmra.mxu1 %v924_v42 }
 0x1a6   : > { %1315 = vmatpush.msra.mxu1 %v2059_v39  ;;  %1006 = vmatpush.msrb.mxu3 %v908_v54  ;;  %v929_v39 = vld [vmem:[%s2229_s2 + $0x58] sm:$0xff] }
 0x1a7   : > { %1079 = vmatpush.msrb.mxu2 %v915_v19 }
 0x1a8   : > { %1316 = vmatpush.msra.mxu1 %v2063_v37  ;;  %1007 = vmatpush.msrb.mxu3 %v906_v41 }
 0x1a9   : > { %1080 = vmatpush.msrb.mxu2 %v913_v11  ;;  %1284 = vmatmul.msk.f32.vlgmr.msrb.gmra.mxu3 %vm932_vm11, %v919_v24 }
 0x1aa   : > { %1317 = vmatpush.msra.mxu1 %v2067_v31  ;;  %1319 = vmatpush.msra.mxu3 %v917_v61 }
 0x1ab   : > { %1081 = vmatpush.msrb.mxu2 %v911_v33  ;;  %1055 = vmatmul.f32.gmra.mxu0 %v924_v42 }
 0x1ac   : > { %1318 = vmatpush.msra.mxu1 %v2074_v3  ;;  %1320 = vmatpush.msra.mxu3 %v915_v19 }
 0x1ad   : > { %1082 = vmatpush.msrb.mxu2 %v909_v55  ;;  %982 = vmatmul.f32.gmra.mxu1 %v926_v6 }
 0x1ae   : > { %1321 = vmatpush.msra.mxu3 %v913_v11 }
 0x1af   : > { %1083 = vmatpush.msrb.mxu2 %v907_v28 }
 0x1b0   : > { %1322 = vmatpush.msra.mxu3 %v911_v33  ;;  %1291 = vmatmul.msk.f32.vlgmr.msrb.gmra.mxu2 %vm932_vm11, %v919_v24 }
 0x1b1   : > { %1285 = vmatmul.msk.f32.gmra.mxu3 %vm932_vm11, %v921_v27 }
 0x1b2   : > { %1323 = vmatpush.msra.mxu3 %v909_v55 }
 0x1b3   : > { %1058 = vmatmul.f32.gmra.mxu0 %v926_v6 }
 0x1b4   : > { %1324 = vmatpush.msra.mxu3 %v907_v28 }
 0x1b5   : > { %985 = vmatmul.f32.gmra.mxu1 %v928_v44 }
 0x1b8   : > { %1292 = vmatmul.msk.f32.gmra.mxu2 %vm932_vm11, %v921_v27 }
 0x1b9   : > { %1286 = vmatmul.msk.f32.gmra.mxu3 %vm932_vm11, %v923_v36 }
 0x1bb   : > { %1061 = vmatmul.f32.gmra.mxu0 %v928_v44 }
 0x1bd   : > { %988 = vmatmul.f32.gmra.mxu1 %v930_v30 }
 0x1c0   : > { %1293 = vmatmul.msk.f32.gmra.mxu2 %vm932_vm11, %v923_v36 }
 0x1c1   : > { %1287 = vmatmul.msk.f32.gmra.mxu3 %vm932_vm11, %v925_v10 }
 0x1c5   : > { %1064 = vmatmul.f32.vlgmr.msra.gmra.mxu1 %v930_v30 }
 0x1c8   : > { %1294 = vmatmul.msk.f32.gmra.mxu2 %vm932_vm11, %v925_v10 }
 0x1c9   : > { %1288 = vmatmul.msk.f32.gmra.mxu3 %vm932_vm11, %v927_v35 }
 0x1d0   : > { %1295 = vmatmul.msk.f32.gmra.mxu2 %vm932_vm11, %v927_v35 }
 0x1d1   : > { %1289 = vmatmul.msk.f32.gmra.mxu3 %vm932_vm11, %v929_v39 }
 0x1d8   : > { %1296 = vmatmul.msk.f32.gmra.mxu2 %vm932_vm11, %v929_v39 }
 0x1d9   : > { %1290 = vmatmul.msk.f32.gmra.mxu3 %vm932_vm11, %v931_v4 }
 0x1e1   : > { %1297 = vmatmul.msk.f32.vlgmr.msra.gmra.mxu3 %vm932_vm11, %v931_v4 }
 0x20a   : > { %v971_v5 = vpop.f32.mrf.mxu1 }
 0x210   : > { %v1047_v37 = vpop.f32.mrf.mxu0 }
 0x212   : > { %v974_v57 = vpop.f32.mrf.mxu1 }
 0x218   : > { %v1050_v16 = vpop.f32.mrf.mxu0 }
 0x21a   : > { %v977_v56 = vpop.f32.mrf.mxu1 }
 0x220   : > { %v1053_v22 = vpop.f32.mrf.mxu0 }
 0x222   : > { %v980_v26 = vpop.f32.mrf.mxu1 }
 0x228   : > { %v1056_v17 = vpop.f32.mrf.mxu0 }
 0x22a   : > { %v983_v14 = vpop.f32.mrf.mxu1 }
 0x22c   : > { %v1009_v62 = vpop.f32.mrf.mxu3 }
 0x22d   : > { %v1010_v31 = vadd.f32 %v1009_v62, %v971_v5 }
 0x22f   : > { %1106 = vst [vmem:[%s2159_s4] sm:$0xff] %v1010_v31 }
 0x230   : > { %v1059_v25 = vpop.f32.mrf.mxu0 }
 0x232   : > { %v986_v0 = vpop.f32.mrf.mxu1 }
 0x233   : > { %v1085_v3 = vpop.f32.mrf.mxu2 }
 0x234   : > { %v1086_v1 = vadd.f32 %v1085_v3, %v1047_v37  ;;  %v1012_v8 = vpop.f32.mrf.mxu3 }
 0x235   : > { %v1013_v43 = vadd.f32 %v1012_v8, %v974_v57 }
 0x236   : > { %1107 = vst [vmem:[%s2159_s4 + $0x8] sm:$0xff] %v1086_v1 }
 0x237   : > { %1108 = vst [vmem:[%s2159_s4 + $0x10] sm:$0xff] %v1013_v43 }
 0x238   : > { %v1062_v53 = vpop.f32.mrf.mxu0 }
 0x23a   : > { %v989_v45 = vpop.f32.mrf.mxu1 }
 0x23b   : > { %v1088_v15 = vpop.f32.mrf.mxu2 }
 0x23c   : > { %v1089_v51 = vadd.f32 %v1088_v15, %v1050_v16  ;;  %v1015_v59 = vpop.f32.mrf.mxu3 }
 0x23d   : > { %v1016_v29 = vadd.f32 %v1015_v59, %v977_v56 }
 0x23e   : > { %1109 = vst [vmem:[%s2159_s4 + $0x18] sm:$0xff] %v1089_v51 }
 0x23f   : > { %1110 = vst [vmem:[%s2159_s4 + $0x20] sm:$0xff] %v1016_v29 }
 0x242   : > { %v1065_v7 = vpop.f32.mrf.mxu1 }
 0x243   : > { %v1091_v18 = vpop.f32.mrf.mxu2 }
 0x244   : > { %v1092_v9 = vadd.f32 %v1091_v18, %v1053_v22  ;;  %v1018_v13 = vpop.f32.mrf.mxu3 }
 0x245   : > { %v1019_v52 = vadd.f32 %v1018_v13, %v980_v26 }
 0x246   : > { %1111 = vst [vmem:[%s2159_s4 + $0x28] sm:$0xff] %v1092_v9 }
 0x247   : > { %1112 = vst [vmem:[%s2159_s4 + $0x30] sm:$0xff] %v1019_v52 }
 0x24b   : > { %v1094_v38 = vpop.f32.mrf.mxu2 }
 0x24c   : > { %v1095_v49 = vadd.f32 %v1094_v38, %v1056_v17  ;;  %v1021_v20 = vpop.f32.mrf.mxu3 }
 0x24d   : > { %v1022_v48 = vadd.f32 %v1021_v20, %v983_v14 }
 0x24e   : > { %1113 = vst [vmem:[%s2159_s4 + $0x38] sm:$0xff] %v1095_v49 }
 0x24f   : > { %1114 = vst [vmem:[%s2159_s4 + $0x40] sm:$0xff] %v1022_v48 }
 0x253   : > { %v1097_v47 = vpop.f32.mrf.mxu2 }
 0x254   : > { %v1098_v23 = vadd.f32 %v1097_v47, %v1059_v25  ;;  %v1024_v58 = vpop.f32.mrf.mxu3 }
 0x255   : > { %v1025_v40 = vadd.f32 %v1024_v58, %v986_v0 }
 0x256   : > { %1115 = vst [vmem:[%s2159_s4 + $0x48] sm:$0xff] %v1098_v23 }
 0x257   : > { %1116 = vst [vmem:[%s2159_s4 + $0x50] sm:$0xff] %v1025_v40 }
 0x25b   : > { %v1100_v63 = vpop.f32.mrf.mxu2 }
 0x25c   : > { %v1101_v2 = vadd.f32 %v1100_v63, %v1062_v53  ;;  %v1027_v50 = vpop.f32.mrf.mxu3 }
 0x25d   : > { %v1028_v32 = vadd.f32 %v1027_v50, %v989_v45 }
 0x25e   : > { %1117 = vst [vmem:[%s2159_s4 + $0x58] sm:$0xff] %v1101_v2 }
 0x25f   : > { %1118 = vst [vmem:[%s2159_s4 + $0x60] sm:$0xff] %v1028_v32 }
 0x264   : > { %v1103_v61 = vpop.f32.mrf.mxu3 }
 0x265   : > { %v1104_v12 = vadd.f32 %v1103_v61, %v1065_v7 }
 0x267   : > { %1119 = vst [vmem:[%s2159_s4 + $0x68] sm:$0xff] %v1104_v12 }
 0x268   : > { %1447 = shalt.err (!%p1444_p11)
}
 0x269   : > { %s1532_s27 = smov 256   ;;  %s1533_s4 = smov 512  }
 0x26a   : > { %s1534_s22 = smov 16  }
 0x26b   : > { %1330 = dma.vmem_to_hbm [thread:$0]  (%p1627_p7), %s1136_s17, 1792, %s1138_s18, %s1121_s28, %s1532_s27, %s1533_s4, %s1534_s22  }
 0x26c PF: > { %p1336_p13 = scmp.ge.s32.totalorder %s1530_s21, 2  ;;  %s1152_s23 = sand.u32 1, %s1494_s12  }
 0x26d   : > { %s1153_s26 = scalar_lea.sflag [#allocation4], %s1152_s23 }
 0x26e   : > { %p1333_p0 = pnand %p1336_p13, %p1635_p12 }
 0x270   : > { %p1334_p1 = pneg %p1333_p0 }
 0x272   : > { %1489 = dma.done.wait (%p1334_p1), %s1153_s26, 1792  }
 0x273   : > { %1491 = vsyncadd (%p1334_p1), %s1153_s26, 4294965504  ;;  %s16_s21 = sadd.s32 1, %s1530_s21   ;;  %s2250_s12 = smov %s1498_s13 }
 0x274   : > { %p13_p2 = scmp.ge.s32.totalorder %s16_s21, 6   ;;  %s2251_s13 = smov %s1502_s14 }
 0x275   : > { %s2252_s14 = smov %s1643_s8  ;;  %s2253_s15 = smov %s1510_s16 }
 0x276   : > { %s2254_s16 = smov %s1640_s7  ;;  %s2255_s17 = smov %s1522_s19 }
 0x277   : > { %s2256_s18 = smov %s1526_s20  ;;  %s2257_s19 = smov %s2260_s24 }
 0x278   : > { %s2258_s20 = smov %s2264_s25  ;;  %15 = sbr.rel (!%p13_p2) target bundleno = 6 (0x6), region = 98 }
 0x27d   :  { %1159 = vsyncpa [#allocation4], 1 }
 0x27e   :  { %1161 = vsyncpa [#allocation4 + $0x1], 1 }

</bundles_post_ra>
